<compile_context>
chip_gen: v6e
topology: v6e:2x2x1
jax: 0.10.0
libtpu: 0.0.40
codegen_flags: <defaults>
</compile_context>

<pallas_src>
import jax
import jax.numpy as jnp
from jax.experimental import pallas as pl
from jax.experimental.pallas import tpu as pltpu

INPUT_DIM = 43
HIDDEN_DIM = 30
OUTPUT_DIM = 10
BN_EPS = 1e-5

_HARD_MAX_TILE = 32768          # keeps double-buffered footprint well under v7x's 64 MiB


def mlp_kernel(x_ref, w1_ref, b1_ref, w2_ref, b2_ref, o_ref):
    # x_ref: (tile, 43) batch-major block (f32 or bf16), streamed as-is from HBM.
    # dp1: identity (eval mode); relu; cast to f32 for the MXU (free, VPU slot idle).
    x = jnp.maximum(x_ref[...], 0).astype(jnp.float32)
    # bn1/bn2 folded into w1/b1.  h^T (30, tile) = W1_eff(30,43) · relu(x)^T:
    # contract both operands' last dims on the MXU (same pattern as q @ k.T),
    # so no explicit transpose is needed and the result stays feature-major.
    h = jax.lax.dot_general(
        w1_ref[...], x,
        dimension_numbers=(((1,), (1,)), ((), ())),
        preferred_element_type=jnp.float32) + b1_ref[...]
    # dp2: identity (eval mode); relu; output linear 30 -> 10.
    h = jnp.maximum(h, 0.0)
    o_ref[...] = jnp.dot(w2_ref[...], h,
                         preferred_element_type=jnp.float32) + b2_ref[...]


def fold_params(p):
    """One-time fold of both eval-mode BatchNorms into the first Linear.

    bn(x) = a*x + c with a = gamma*rsqrt(var+eps), c = beta - mean*a.
    relu -> bn1 -> linear -> bn2  becomes  relu -> (x @ W1_eff + b1_eff).
    Weights returned feature-major: W as (out, in), bias as (out, 1).
    """
    a1 = p["g1"] * jax.lax.rsqrt(p["v1"] + BN_EPS)       # (1, 43)
    c1 = p["b1"] - p["m1"] * a1
    a2 = p["g2"] * jax.lax.rsqrt(p["v2"] + BN_EPS)       # (1, 30)
    c2 = p["b2"] - p["m2"] * a2

    w1_eff = a1.reshape(-1, 1) * p["w1"] * a2            # (43, 30)
    b1_eff = a2 * (c1 @ p["w1"] + p["bl1"]) + c2         # (1, 30)

    return dict(
        w1=jnp.asarray(w1_eff.T, jnp.float32),           # (30, 43)
        b1=jnp.asarray(b1_eff.T, jnp.float32),           # (30, 1)
        w2=jnp.asarray(p["w2"].T, jnp.float32),          # (10, 30)
        b2=jnp.asarray(p["bl2"].T, jnp.float32),         # (10, 1)
    )


def _round_up(a, m):
    return -(-a // m) * m


def _pick_tile(n, max_tile):
    """Batch-tile size: multiple of 128, <= max_tile, >=2 grid steps if possible."""
    max_tile = max(128, min(int(max_tile), _HARD_MAX_TILE))
    max_tile = (max_tile // 128) * 128
    n128 = _round_up(max(n, 1), 128)
    tile = min(max_tile, n128)
    # Keep at least 2 grid steps when the batch allows it so
    # dimension_semantics=("parallel",) can shard across v7x's 2 TensorCores.
    if n128 >= 256 and tile * 2 > n128:
        tile = _round_up(n128 // 2, 128)
    return tile


def mlp_forward(x, folded, *, max_tile=16384, out_feature_major=False):
    """x: (N, 43) f32 or bf16.  Returns (N, 10) f32 (or (10, N) if out_feature_major)."""
    n = x.shape[0]
    tile = _pick_tile(n, max_tile)
    grid = (pl.cdiv(n, tile),)

    param_bytes = 4 * (HIDDEN_DIM * INPUT_DIM + HIDDEN_DIM
                       + OUTPUT_DIM * HIDDEN_DIM + OUTPUT_DIM)
    cost = pl.CostEstimate(
        flops=2 * n * (INPUT_DIM * HIDDEN_DIM + HIDDEN_DIM * OUTPUT_DIM),
        transcendentals=0,
        bytes_accessed=n * (INPUT_DIM * x.dtype.itemsize + OUTPUT_DIM * 4) + param_bytes,
    )

    # 32 MB covers <=16K-row tiles with headroom on v5e/v6e/v7x; only larger,
    # caller-requested tiles need more (still far from v7x's 64 MiB physical).
    vmem_limit = (48 if tile > 16384 else 32) * 1024 * 1024

    out_fm = pl.pallas_call(
        mlp_kernel,
        out_shape=jax.ShapeDtypeStruct((OUTPUT_DIM, n), jnp.float32),
        grid=grid,
        in_specs=[
            # Activations: batch-major contiguous (tile, 43) blocks, ragged tail
            # handled by Pallas (feature dim stays full-size -> padding garbage
            # only reaches discarded output columns).
            pl.BlockSpec((tile, INPUT_DIM), lambda i: (i, 0)),
            # Weights / biases: VMEM-resident (constant index_map).
            pl.BlockSpec((HIDDEN_DIM, INPUT_DIM), lambda i: (0, 0)),
            pl.BlockSpec((HIDDEN_DIM, 1), lambda i: (0, 0)),
            pl.BlockSpec((OUTPUT_DIM, HIDDEN_DIM), lambda i: (0, 0)),
            pl.BlockSpec((OUTPUT_DIM, 1), lambda i: (0, 0)),
        ],
        out_specs=pl.BlockSpec((OUTPUT_DIM, tile), lambda i: (0, i)),  # lane-dense
        compiler_params=pltpu.CompilerParams(
            dimension_semantics=("parallel",),   # v7x: split batch blocks over 2 TCs
            vmem_limit_bytes=vmem_limit,
        ),
        cost_estimate=cost,
    )(x, folded["w1"], folded["b1"], folded["w2"], folded["b2"])

    if out_feature_major:
        return out_fm            # (10, N): skips the final transpose pass
    return out_fm.T              # (N, 10): matches the PyTorch module's layout


def init_params(key):
    """Parameter init mirroring the PyTorch module's shapes.

    nn.Linear(in, out): weight stored pre-transposed as (in, out), bias (1, out).
    BatchNorm1d params perturbed deterministically so the BN math is exercised.
    """
    ks = jax.random.split(key, 8)

    def linear(kw, kb, fan_in, fan_out):
        bound = 1.0 / jnp.sqrt(jnp.float32(fan_in))
        w = jax.random.uniform(kw, (fan_in, fan_out), jnp.float32, -bound, bound)
        b = jax.random.uniform(kb, (1, fan_out), jnp.float32, -bound, bound)
        return w, b

    w1, bl1 = linear(ks[0], ks[1], INPUT_DIM, HIDDEN_DIM)
    w2, bl2 = linear(ks[2], ks[3], HIDDEN_DIM, OUTPUT_DIM)

    def bn(kg, kb, dim):
        g = 1.0 + 0.1 * jax.random.normal(kg, (1, dim), jnp.float32)
        b = 0.1 * jax.random.normal(kb, (1, dim), jnp.float32)
        m = 0.05 * jax.random.normal(jax.random.fold_in(kg, 1), (1, dim), jnp.float32)
        v = 1.0 + 0.1 * jax.random.uniform(jax.random.fold_in(kb, 1), (1, dim), jnp.float32)
        return g, b, m, v

    g1, b1, m1, v1 = bn(ks[4], ks[5], INPUT_DIM)
    g2, b2, m2, v2 = bn(ks[6], ks[7], HIDDEN_DIM)

    return dict(g1=g1, b1=b1, m1=m1, v1=v1, w1=w1, bl1=bl1,
                g2=g2, b2=b2, m2=m2, v2=v2, w2=w2, bl2=bl2)


def mlp_reference(x, p):
    """Pure-JAX reference of the same eval-mode forward pass (unfused)."""
    x = jnp.maximum(x, 0.0)
    x = (x - p["m1"]) * jax.lax.rsqrt(p["v1"] + BN_EPS) * p["g1"] + p["b1"]
    h = x @ p["w1"] + p["bl1"]
    h = (h - p["m2"]) * jax.lax.rsqrt(p["v2"] + BN_EPS) * p["g2"] + p["b2"]
    h = jnp.maximum(h, 0.0)
    return h @ p["w2"] + p["bl2"]


if __name__ == "__main__":
    key = jax.random.PRNGKey(0)
    k_x, k_x2, k_p = jax.random.split(key, 3)

    params = init_params(k_p)
    folded = fold_params(params)   # one-time BN-into-Linear fold

    # Small batch: single ragged block (8 rows inside a 128-row tile).
    batch = 8
    x = jax.random.normal(k_x, (batch, INPUT_DIM), jnp.float32)
    out = jax.block_until_ready(mlp_forward(x, folded))
    ref = mlp_reference(x, params)
    assert out.shape == (batch, OUTPUT_DIM)
    assert jnp.allclose(out, ref, atol=1e-4, rtol=1e-4)

    # Larger batch, default tiling: 2 grid steps with a ragged tail (600 -> 384+216).
    batch2 = 600
    x2 = jax.random.normal(k_x2, (batch2, INPUT_DIM), jnp.float32)
    out2 = jax.block_until_ready(mlp_forward(x2, folded))
    ref2 = mlp_reference(x2, params)
    assert out2.shape == (batch2, OUTPUT_DIM)
    assert jnp.allclose(out2, ref2, atol=1e-4, rtol=1e-4)

    # Forced small tile: 3 grid steps, exercises the pipelined multi-step path.
    out3 = jax.block_until_ready(mlp_forward(x2, folded, max_tile=256))
    assert jnp.allclose(out3, ref2, atol=1e-4, rtol=1e-4)

    # bf16 activation streaming (halves the dominant HBM read); compare against
    # the f32 reference evaluated on the same bf16-quantized input.
    x2_bf = x2.astype(jnp.bfloat16)
    out4 = jax.block_until_ready(mlp_forward(x2_bf, folded))
    ref4 = mlp_reference(x2_bf.astype(jnp.float32), params)
    assert jnp.allclose(out4, ref4, atol=1e-3, rtol=1e-3)

    # Feature-major output path (skips the final transpose pass entirely).
    out5 = jax.block_until_ready(mlp_forward(x2, folded, out_feature_major=True))
    assert out5.shape == (OUTPUT_DIM, batch2)
    assert jnp.allclose(out5.T, ref2, atol=1e-4, rtol=1e-4)

    print("KERNEL_OK")
</pallas_src>

<mosaic_0001>
module attributes {stable_mosaic.version = 11 : i64} {
  func.func @mlp_kernel(%arg0: i32, %arg1: memref<128x43xf32, #tpu.memory_space<vmem>>, %arg2: memref<30x43xf32, #tpu.memory_space<vmem>>, %arg3: memref<30x1xf32, #tpu.memory_space<vmem>>, %arg4: memref<10x30xf32, #tpu.memory_space<vmem>>, %arg5: memref<10x1xf32, #tpu.memory_space<vmem>>, %arg6: memref<10x128xf32, #tpu.memory_space<vmem>>) attributes {dimension_semantics = [#tpu.dimension_semantics<parallel>], iteration_bounds = array<i64: 1>, scalar_prefetch = 0 : i64, scratch_operands = 0 : i64, tpu.core_type = #tpu.core_type<tc>, window_params = [{transform_indices = @transform_0, window_bounds = array<i64: 128, 43>}, {pipeline_mode = #tpu.pipeline_mode<synchronous>, transform_indices = @transform_1, window_bounds = array<i64: 30, 43>}, {pipeline_mode = #tpu.pipeline_mode<synchronous>, transform_indices = @transform_2, window_bounds = array<i64: 30, 1>}, {pipeline_mode = #tpu.pipeline_mode<synchronous>, transform_indices = @transform_3, window_bounds = array<i64: 10, 30>}, {pipeline_mode = #tpu.pipeline_mode<synchronous>, transform_indices = @transform_4, window_bounds = array<i64: 10, 1>}, {transform_indices = @transform_5, window_bounds = array<i64: 10, 128>}]} {
    %c0 = arith.constant 0 : index
    %c0_0 = arith.constant 0 : index
    %0 = vector.load %arg1[%c0, %c0_0] : memref<128x43xf32, #tpu.memory_space<vmem>>, vector<128x43xf32>
    %cst = arith.constant 0.000000e+00 : f32
    %1 = vector.broadcast %cst : f32 to vector<128x43xf32>
    %2 = arith.maximumf %0, %1 : vector<128x43xf32>
    %c0_1 = arith.constant 0 : index
    %c0_2 = arith.constant 0 : index
    %3 = vector.load %arg2[%c0_1, %c0_2] : memref<30x43xf32, #tpu.memory_space<vmem>>, vector<30x43xf32>
    %cst_3 = arith.constant dense<0.000000e+00> : vector<30x128xf32>
    %4 = tpu.matmul %3, %2, %cst_3 {dimension_numbers = #tpu.dot_dimension_numbers<[1], [1], [0], [0], [0, 0, 1, 0], [], []>} : vector<30x43xf32>, vector<128x43xf32>, vector<30x128xf32> -> vector<30x128xf32>
    %c0_4 = arith.constant 0 : index
    %c0_5 = arith.constant 0 : index
    %5 = vector.load %arg3[%c0_4, %c0_5] : memref<30x1xf32, #tpu.memory_space<vmem>>, vector<30x1xf32>
    %6 = vector.broadcast %5 : vector<30x1xf32> to vector<30x128xf32>
    %7 = arith.addf %4, %6 : vector<30x128xf32>
    %cst_6 = arith.constant 0.000000e+00 : f32
    %8 = vector.broadcast %cst_6 : f32 to vector<30x128xf32>
    %9 = arith.maximumf %7, %8 : vector<30x128xf32>
    %c0_7 = arith.constant 0 : index
    %c0_8 = arith.constant 0 : index
    %10 = vector.load %arg4[%c0_7, %c0_8] : memref<10x30xf32, #tpu.memory_space<vmem>>, vector<10x30xf32>
    %cst_9 = arith.constant dense<0.000000e+00> : vector<10x128xf32>
    %11 = tpu.matmul %10, %9, %cst_9 {dimension_numbers = #tpu.dot_dimension_numbers<[1], [0], [0], [1], [0, 0, 1, 1], [], []>} : vector<10x30xf32>, vector<30x128xf32>, vector<10x128xf32> -> vector<10x128xf32>
    %c0_10 = arith.constant 0 : index
    %c0_11 = arith.constant 0 : index
    %12 = vector.load %arg5[%c0_10, %c0_11] : memref<10x1xf32, #tpu.memory_space<vmem>>, vector<10x1xf32>
    %13 = vector.broadcast %12 : vector<10x1xf32> to vector<10x128xf32>
    %14 = arith.addf %11, %13 : vector<10x128xf32>
    %c0_12 = arith.constant 0 : index
    %c0_13 = arith.constant 0 : index
    %15 = vector.load %arg6[%c0_12, %c0_13] : memref<10x128xf32, #tpu.memory_space<vmem>>, vector<10x128xf32>
    tpu.vector_store %arg6[%c0_12, %c0_13], %14 {strides = array<i32>} : memref<10x128xf32, #tpu.memory_space<vmem>>, vector<10x128xf32>,
    return
  }
  func.func @transform_0(%arg0: i32) -> (i32, i32) {
    %c0_i32 = arith.constant 0 : i32
    %c0_i32_0 = arith.constant 0 : i32
    return %arg0, %c0_i32 : i32, i32
  }
  func.func @transform_1(%arg0: i32) -> (i32, i32) {
    %c0_i32 = arith.constant 0 : i32
    %c0_i32_0 = arith.constant 0 : i32
    %c0_i32_1 = arith.constant 0 : i32
    return %c0_i32, %c0_i32_0 : i32, i32
  }
  func.func @transform_2(%arg0: i32) -> (i32, i32) {
    %c0_i32 = arith.constant 0 : i32
    %c0_i32_0 = arith.constant 0 : i32
    %c0_i32_1 = arith.constant 0 : i32
    return %c0_i32, %c0_i32_0 : i32, i32
  }
  func.func @transform_3(%arg0: i32) -> (i32, i32) {
    %c0_i32 = arith.constant 0 : i32
    %c0_i32_0 = arith.constant 0 : i32
    %c0_i32_1 = arith.constant 0 : i32
    return %c0_i32, %c0_i32_0 : i32, i32
  }
  func.func @transform_4(%arg0: i32) -> (i32, i32) {
    %c0_i32 = arith.constant 0 : i32
    %c0_i32_0 = arith.constant 0 : i32
    %c0_i32_1 = arith.constant 0 : i32
    return %c0_i32, %c0_i32_0 : i32, i32
  }
  func.func @transform_5(%arg0: i32) -> (i32, i32) {
    %c0_i32 = arith.constant 0 : i32
    %c0_i32_0 = arith.constant 0 : i32
    return %c0_i32, %arg0 : i32, i32
  }
}

</mosaic_0001>

<bundles_post_ra>
// kernel: tpu_custom_call.1
= control target key start
LH: loop header
LB: loop body
LE: loop exit
PB: predicated region body
PF: predicated region fallthrough
CT: control target
= control target key end

     0   :  { %10 = vsyncpa [#allocation3], 0  ;;  %s594_s0 = inlined_call_operand.hbm [shape: f32[8,43], index: 0, kind: input, shape index: {}]   ;;  %s595_s1 = inlined_call_operand.vmem [shape: f32[30,43], index: 1, kind: input, shape index: {}]   ;;  %s596_s2 = inlined_call_operand.vmem [shape: f32[30,1], index: 2, kind: input, shape index: {}]   ;;  %s597_s3 = inlined_call_operand.vmem [shape: f32[10,30], index: 3, kind: input, shape index: {}]   ;;  %s598_s4 = inlined_call_operand.vmem [shape: f32[10,1], index: 4, kind: input, shape index: {}]   ;;  %s599_s5 = inlined_call_operand.vmem [shape: f32[10,8], index: 5, kind: output, shape index: {}]  }
   0x1   :  { %15 = vsyncadd [#allocation3], 1920  ;;  %s477_s18 = smov [#allocation2]  }
   0x2   :  { %s16_s19 = sshll.u32 %s477_s18, 4  ;;  %s17_s19 = int_to_ptr.vmem [resolvable:$true] %s16_s19 }
   0x3   :  { %s463_s20 = scalar_lea.vmem %s17_s19, 128  ;;  %s467_s21 = scalar_lea.vmem %s17_s19, 2048 }
   0x4   :  { %p464_p0 = scmp.ne.s32.totalorder %s17_s19, %s463_s20  ;;  %p468_p1 = scmp.lt.s32.totalorder %s17_s19, %s17_s19 }
   0x5   :  { %p469_p2 = scmp.lt.s32.totalorder %s467_s21, %s463_s20 }
   0x7   :  { %p470_p3 = por %p469_p2, %p468_p1 }
   0x9   :  { %p471_p4 = pnand %p470_p3, %p464_p0 }
   0xb   :  { %474 = shalt.err (!%p471_p4)
}
   0xc   :  { %s478_s22 = smov 128   ;;  %s479_s23 = smov 8  }
   0xd   :  { %22 = dma.hbm_to_vmem [thread:$0]  %s594_s0, 128, %s17_s19, [#allocation3], %s478_s22, %s478_s22, %s479_s23  }
   0xe   :  { %475 = dma.done.wait [#allocation3], 2048  }
   0xf   :  { %476 = vsyncadd [#allocation3], 4294965248  ;;  %v480_v0 = vmov 0   ;;  %v49_v1 = vld [vmem:[#allocation2 + $0x78] sm:$0xff]  ;;  %vm94_vm0 = vcmask 351232   ;;  %v48_v2 = vld [vmem:[#allocation2 + $0x70] sm:$0xff] }
  0x10   :  { %453 = vset.pattern.permute.xlu0 %v480_v0  ;;  %454 = vset.pattern.permute.xlu1 %v480_v0  ;;  %v65_v3 = vmax.f32 %v49_v1, 0.0  ;;  %v64_v4 = vmax.f32 %v48_v2, 0.0  ;;  %v47_v5 = vld [vmem:[#allocation2 + $0x68] sm:$0xff]  ;;  %v66_v7 = vld [vmem:[%s595_s1] sm:$0xff]  ;;  %v73_v9 = vld [vmem:[%s596_s2 + $0x18] sm:$0x3f] }
  0x11   :  { %v63_v6 = vmax.f32 %v47_v5, 0.0  ;;  %v46_v8 = vld [vmem:[#allocation2 + $0x60] sm:$0xff]  ;;  %432 = vmatprep.mubr.msk.f32.mxu0 %vm94_vm0, %v66_v7  ;;  %91 = vperm.xlu0 %453, %v73_v9   ;;  %v71_v10 = vld [vmem:[%s596_s2 + $0x8] sm:$0xff]  ;;  %v72_v11 = vld [vmem:[%s596_s2 + $0x10] sm:$0xff]  ;;  %vm258_vm1 = vcmask 244736   ;;  %vm265_vm2 = vcmask 1045504  }
  0x12   :  { %400 = vmatprep.subr.msk.mxu0 %vm94_vm0, %v65_v3  ;;  %81 = vperm.xlu1 %454, %v71_v10   ;;  %v62_v12 = vmax.f32 %v46_v8, 0.0  ;;  %v70_v13 = vld [vmem:[%s596_s2] sm:$0xff]  ;;  %v45_v14 = vld [vmem:[#allocation2 + $0x58] sm:$0xff]  ;;  %v247_v17 = vld [vmem:[%s598_s4 + $0x8] sm:$0x3] }
  0x13   :  { %401 = vmatpush3.xpose.msk.msra.mxu0 %vm94_vm0, %v65_v3  ;;  %v246_v15 = vld [vmem:[%s598_s4] sm:$0xff]  ;;  %v61_v16 = vmax.f32 %v45_v14, 0.0  ;;  %v44_v18 = vld [vmem:[#allocation2 + $0x50] sm:$0xff]  ;;  %v43_v20 = vld [vmem:[#allocation2 + $0x48] sm:$0xff] }
  0x14   :  { %402 = vmatprep.subr.msk.mxu0 %vm94_vm0, %v64_v4  ;;  %v60_v19 = vmax.f32 %v44_v18, 0.0  ;;  %v59_v21 = vmax.f32 %v43_v20, 0.0  ;;  %v42_v22 = vld [vmem:[#allocation2 + $0x40] sm:$0xff]  ;;  %v41_v24 = vld [vmem:[#allocation2 + $0x38] sm:$0xff]  ;;  %v40_v26 = vld [vmem:[#allocation2 + $0x30] sm:$0xff] }
  0x15   :  { %86 = vperm.xlu0 %453, %v72_v11   ;;  %v58_v23 = vmax.f32 %v42_v22, 0.0  ;;  %v57_v25 = vmax.f32 %v41_v24, 0.0  ;;  %v56_v27 = vmax.f32 %v40_v26, 0.0  ;;  %v39_v28 = vld [vmem:[#allocation2 + $0x28] sm:$0xff]  ;;  %v38_v30 = vld [vmem:[#allocation2 + $0x20] sm:$0xff]  ;;  %v37_v32 = vld [vmem:[#allocation2 + $0x18] sm:$0xff] }
  0x16   :  { %76 = vperm.xlu1 %454, %v70_v13   ;;  %v55_v29 = vmax.f32 %v39_v28, 0.0  ;;  %v54_v31 = vmax.f32 %v38_v30, 0.0  ;;  %v53_v33 = vmax.f32 %v37_v32, 0.0  ;;  %v36_v34 = vld [vmem:[#allocation2 + $0x10] sm:$0xff]  ;;  %v35_v36 = vld [vmem:[#allocation2 + $0x8] sm:$0xff]  ;;  %v34_v38 = vld [vmem:[#allocation2] sm:$0xff] }
  0x17   :  { %403 = vmatpush3.xpose.msk.msra.mxu0 %vm94_vm0, %v64_v4  ;;  %v52_v35 = vmax.f32 %v36_v34, 0.0  ;;  %v51_v37 = vmax.f32 %v35_v36, 0.0  ;;  %v50_v39 = vmax.f32 %v34_v38, 0.0  ;;  %v67_v40 = vld [vmem:[%s595_s1 + $0x8] sm:$0xff]  ;;  %v68_v41 = vld [vmem:[%s595_s1 + $0x10] sm:$0xff]  ;;  %v244_v43 = vld [vmem:[%s597_s3] sm:$0xff] }
  0x18   :  { %404 = vmatprep.subr.msk.mxu0 %vm94_vm0, %v63_v6  ;;  %v69_v42 = vld [vmem:[%s595_s1 + $0x18] sm:$0x3f]  ;;  %446 = vmatprep.mubr.msk.f32.mxu1 %vm258_vm1, %v244_v43  ;;  %v245_v60 = vld [vmem:[%s597_s3 + $0x8] sm:$0x3] }
  0x19   :  { %250 = vperm.xlu0 %453, %v246_v15  }
  0x1a   :  { %255 = vperm.xlu1 %454, %v247_v17  }
  0x1b   :  { %405 = vmatpush3.xpose.msk.msra.mxu0 %vm94_vm0, %v63_v6 }
  0x1c   :  { %406 = vmatprep.subr.msk.mxu0 %vm94_vm0, %v62_v12 }
  0x1f   :  { %407 = vmatpush3.xpose.msk.msra.mxu0 %vm94_vm0, %v62_v12 }
  0x20   :  { %408 = vmatprep.subr.msk.mxu0 %vm94_vm0, %v61_v16 }
  0x23   :  { %409 = vmatpush3.xpose.msk.msra.mxu0 %vm94_vm0, %v61_v16 }
  0x24   :  { %410 = vmatprep.subr.msk.mxu0 %vm94_vm0, %v60_v19 }
  0x27   :  { %411 = vmatpush3.xpose.msk.msra.mxu0 %vm94_vm0, %v60_v19 }
  0x28   :  { %412 = vmatprep.subr.msk.mxu0 %vm94_vm0, %v59_v21 }
  0x2b   :  { %413 = vmatpush3.xpose.msk.msra.mxu0 %vm94_vm0, %v59_v21 }
  0x2c   :  { %414 = vmatprep.subr.msk.mxu0 %vm94_vm0, %v58_v23 }
  0x2f   :  { %415 = vmatpush3.xpose.msk.msra.mxu0 %vm94_vm0, %v58_v23 }
  0x30   :  { %416 = vmatprep.subr.msk.mxu0 %vm94_vm0, %v57_v25 }
  0x33   :  { %417 = vmatpush3.xpose.msk.msra.mxu0 %vm94_vm0, %v57_v25 }
  0x34   :  { %418 = vmatprep.subr.msk.mxu0 %vm94_vm0, %v56_v27 }
  0x37   :  { %419 = vmatpush3.xpose.msk.msra.mxu0 %vm94_vm0, %v56_v27 }
  0x38   :  { %420 = vmatprep.subr.msk.mxu0 %vm94_vm0, %v55_v29 }
  0x3b   :  { %421 = vmatpush3.xpose.msk.msra.mxu0 %vm94_vm0, %v55_v29 }
  0x3c   :  { %422 = vmatprep.subr.msk.mxu0 %vm94_vm0, %v54_v31 }
  0x3f   :  { %423 = vmatpush3.xpose.msk.msra.mxu0 %vm94_vm0, %v54_v31 }
  0x40   :  { %424 = vmatprep.subr.msk.mxu0 %vm94_vm0, %v53_v33 }
  0x43   :  { %425 = vmatpush3.xpose.msk.msra.mxu0 %vm94_vm0, %v53_v33 }
  0x44   :  { %426 = vmatprep.subr.msk.mxu0 %vm94_vm0, %v52_v35 }
  0x47   :  { %427 = vmatpush3.xpose.msk.msra.mxu0 %vm94_vm0, %v52_v35 }
  0x48   :  { %428 = vmatprep.subr.msk.mxu0 %vm94_vm0, %v51_v37 }
  0x4b   :  { %429 = vmatpush3.xpose.msk.msra.mxu0 %vm94_vm0, %v51_v37 }
  0x4c   :  { %430 = vmatprep.subr.msk.mxu0 %vm94_vm0, %v50_v39 }
  0x4f   :  { %431 = vmatpush3.xpose.msk.msra.mxu0 %vm94_vm0, %v50_v39 }
  0x52   :  { %433 = vmatmul.mubr.msk.f32.vlgmr.msra.gmra.mxu0 %vm94_vm0, %v67_v40 }
  0x53   :  { %435 = vmatprep.mubr.msk.f32.mxu0 %vm94_vm0, %v68_v41 }
  0x56   :  { %436 = vmatmul.mubr.msk.f32.gmra.mxu0 %vm94_vm0, %v69_v42 }
  0x8c   :  { %v92_v44 = vpop.permute.xlu0 %91 }
  0x8d   :  { %v82_v45 = vpop.permute.xlu1 %81 }
  0x90   :  { %v87_v49 = vpop.permute.xlu0 %86 }
  0x91   :  { %v77_v51 = vpop.permute.xlu1 %76 }
  0x94   :  { %v251_v0 = vpop.permute.xlu0 %250 }
  0x95   :  { %v256_v61 = vpop.permute.xlu1 %255 }
 0x112   :  { %v434_v46 = vpop.f32.mrf.mxu0 }
 0x113   :  { %v227_v53 = vadd.f32 %v434_v46, %v82_v45 }
 0x114   :  { %v221_v47 = vpop.f32.mrf.mxu0 }
 0x115   :  { %v222_v56 = vadd.f32 %v221_v47, %v77_v51  ;;  %v241_v58 = vmax.f32 %v227_v53, 0.0 }
 0x116   :  { %v437_v48 = vpop.f32.mrf.mxu0 }
 0x117   :  { %v237_v50 = vadd.f32 %v437_v48, %v92_v44  ;;  %v240_v59 = vmax.f32 %v222_v56, 0.0 }
 0x118   :  { %v231_v52 = vpop.f32.mrf.mxu0 }
 0x119   :  { %v243_v54 = vmax.f32 %v237_v50, 0.0  ;;  %v232_v55 = vadd.f32 %v231_v52, %v87_v49 }
 0x11b   :  { %v242_v57 = vmax.f32 %v232_v55, 0.0  ;;  %438 = vmatprep.subr.msk.mxu1 %vm265_vm2, %v243_v54 }
 0x11c   :  { %439 = vmatpush3.msk.msra.mxu1 %vm265_vm2, %v243_v54 }
 0x11d   :  { %440 = vmatprep.subr.mxu1 %v242_v57 }
 0x11e   :  { %441 = vmatpush3.msra.mxu1 %v242_v57 }
 0x11f   :  { %442 = vmatprep.subr.mxu1 %v241_v58 }
 0x120   :  { %443 = vmatpush3.msra.mxu1 %v241_v58 }
 0x121   :  { %444 = vmatprep.subr.mxu1 %v240_v59 }
 0x122   :  { %445 = vmatpush3.msra.mxu1 %v240_v59 }
 0x123   :  { %447 = vmatmul.mubr.msk.f32.vlgmr.msra.gmra.mxu1 %vm258_vm1, %v245_v60 }
 0x1e3   :  { %v448_v62 = vpop.f32.mrf.mxu1 }
 0x1e4   :  { %v341_v63 = vadd.f32 %v448_v62, %v256_v61 }
 0x1e5   :  { %v335_v1 = vpop.f32.mrf.mxu1 }
 0x1e6   :  { %345 = vst [vmem:[%s599_s5 + $0x8] sm:$0x3] %v341_v63  ;;  %v336_v2 = vadd.f32 %v335_v1, %v251_v0 }
 0x1e8   :  { %344 = vst [vmem:[%s599_s5] sm:$0xff] %v336_v2 }
 0x1e9   :  { %350 = vsyncpa [#allocation3], 1 }

</bundles_post_ra>
